<compile_context>
chip_gen: v5e
topology: v5e:2x2
jax: 0.10.0
libtpu: 0.0.40
codegen_flags: <defaults>
</compile_context>

<pallas_src>
import jax
import jax.numpy as jnp
from jax.experimental import pallas as pl
from jax.experimental.pallas import tpu as pltpu

LANE = 128


def _round_up(n, m):
    return ((n + m - 1) // m) * m


def _make_qnet_kernel(n_layers, compute_dtype):
    """Kernel over refs: (x, w_0, b_0, ..., w_{L-1}, b_{L-1}, out).
    Hidden layers apply ReLU; the final layer is linear."""
    def kernel(*refs):
        x_ref, o_ref = refs[0], refs[-1]
        wb = refs[1:-1]
        h = x_ref[...]                       # bf16 (tb, state_dim)
        for li in range(n_layers):
            w = wb[2 * li][...]              # bf16 (d_in, d_out)
            b = wb[2 * li + 1][...]          # f32  (1, d_out)
            acc = jnp.dot(h, w, preferred_element_type=jnp.float32) + b
            if li < n_layers - 1:
                # ReLU, then drop back to bf16 once (halves vreg pressure).
                h = jnp.maximum(acc, 0.0).astype(compute_dtype)
            else:
                h = acc                      # final layer stays f32
        o_ref[...] = h.astype(o_ref.dtype)
    return kernel


def prepare_qnetwork_params(params, *, compute_dtype=jnp.bfloat16):
    """One-time parameter prep (hoisted out of the per-call path).

    params = [(w, b), ...] with w as (in_features, out_features)
    (transpose of PyTorch's nn.Linear layout).

    Hidden-layer output dims are zero-padded to 128 lanes so intermediate
    activations are lane-dense; the final layer's output dim is left unpadded
    so the kernel's HBM writeback is exactly (batch, action_dim).
    Zero padding keeps results exact: ReLU(0)=0 and padded weight rows/cols
    and bias lanes are zero.  Weights -> bf16, biases stay f32.
    """
    prepared = []
    n = len(params)
    in_dim = params[0][0].shape[0]
    for li, (w, b) in enumerate(params):
        fan_in, fan_out = w.shape
        out_p = fan_out if li == n - 1 else _round_up(fan_out, LANE)
        w_p = jnp.zeros((in_dim, out_p), compute_dtype)
        w_p = w_p.at[:fan_in, :fan_out].set(w.astype(compute_dtype))
        b_p = jnp.zeros((1, out_p), jnp.float32)
        b_p = b_p.at[:, :fan_out].set(b.reshape(1, -1).astype(jnp.float32))
        prepared.append((w_p, b_p))
        in_dim = out_p
    return prepared


def qnetwork_forward(x, prepared_params, *, compute_dtype=jnp.bfloat16,
                     batch_tile=1024):
    """Fused QNetwork forward on pre-padded params (prepare_qnetwork_params)."""
    batch, state_dim = x.shape
    n_layers = len(prepared_params)
    action_dim = prepared_params[-1][0].shape[1]

    # Stream input activations as bf16 (kernel math is identical: the dot's
    # lhs operand was already cast to bf16 in-kernel before).
    x_in = x.astype(compute_dtype)

    # Batch tile: multiple of 8 sublanes; no full-array padding copy of x —
    # grid uses cdiv and Pallas masks the partial last block on read/write.
    tb = min(batch_tile, _round_up(batch, 8))
    grid = (pl.cdiv(batch, tb),)

    in_specs = [pl.BlockSpec((tb, state_dim), lambda i: (i, 0))]
    flat_args = [x_in]
    for (w_p, b_p) in prepared_params:
        # Constant index_map -> weights/biases stay VMEM-resident across the
        # batch grid (total weight footprint here is ~0.1 MiB, fine on every
        # generation; see TODO below for very large hidden_units).
        in_specs.append(pl.BlockSpec(w_p.shape, lambda i: (0, 0)))
        in_specs.append(pl.BlockSpec(b_p.shape, lambda i: (0, 0)))
        flat_args += [w_p, b_p]

    out_specs = pl.BlockSpec((tb, action_dim), lambda i: (i, 0))
    out_shape = jax.ShapeDtypeStruct((batch, action_dim), jnp.float32)

    # Advisory cost estimate for the XLA scheduler.
    flops = 0
    bytes_accessed = (x_in.size * x_in.dtype.itemsize
                      + batch * action_dim * 4)
    d_in = state_dim
    for (w_p, b_p) in prepared_params:
        flops += 2 * batch * d_in * w_p.shape[1]
        bytes_accessed += w_p.size * w_p.dtype.itemsize + b_p.size * 4
        d_in = w_p.shape[1]

    # TODO(synk): if hidden_units ever grow to >=4096, weights should no longer
    # be fully VMEM-resident (v7x has 64 MiB VMEM) — add a K-tiled grid axis.
    return pl.pallas_call(
        _make_qnet_kernel(n_layers, compute_dtype),
        out_shape=out_shape,
        grid=grid,
        in_specs=in_specs,
        out_specs=out_specs,
        compiler_params=pltpu.CompilerParams(
            dimension_semantics=("parallel",)),
        cost_estimate=pl.CostEstimate(
            flops=flops, transcendentals=0, bytes_accessed=bytes_accessed),
    )(*flat_args)


def init_qnetwork_params(key, state_dim, action_dim, hidden_units):
    """Init matching the PyTorch module's __init__ semantics:
    - first hidden layer: default nn.Linear-style U(-1/sqrt(fan_in), +)
    - later hidden layers and output layer: U(-0.003, 0.003)."""
    params = []
    dims = [state_dim] + list(hidden_units)
    for i in range(len(hidden_units)):
        key, kw, kb = jax.random.split(key, 3)
        fan_in, fan_out = dims[i], dims[i + 1]
        bound = (1.0 / jnp.sqrt(fan_in)) if i == 0 else 0.003
        w = jax.random.uniform(kw, (fan_in, fan_out), jnp.float32, -bound, bound)
        b = jax.random.uniform(kb, (1, fan_out), jnp.float32, -bound, bound)
        params.append((w, b))
    key, kw, kb = jax.random.split(key, 3)
    w = jax.random.uniform(kw, (hidden_units[-1], action_dim), jnp.float32,
                           -0.003, 0.003)
    b = jax.random.uniform(kb, (1, action_dim), jnp.float32, -0.003, 0.003)
    params.append((w, b))
    return params


def qnetwork_ref(x, params, compute_dtype=jnp.bfloat16):
    """Pure-JAX reference with the same bf16-operand / f32-accumulate math."""
    h = x.astype(jnp.float32)
    for li, (w, b) in enumerate(params):
        acc = jnp.dot(h.astype(compute_dtype), w.astype(compute_dtype),
                      preferred_element_type=jnp.float32) + b.reshape(1, -1)
        h = jnp.maximum(acc, 0.0) if li < len(params) - 1 else acc
    return h


if __name__ == "__main__":
    key = jax.random.PRNGKey(0)

    # Small shapes consistent with the module: 2 hidden layers.
    batch, state_dim, hidden_units, action_dim = 8, 16, (32, 32), 8

    key, kx, kp = jax.random.split(key, 3)
    x = jax.random.normal(kx, (batch, state_dim), jnp.float32)
    params = init_qnetwork_params(kp, state_dim, action_dim, hidden_units)
    prepared = prepare_qnetwork_params(params)   # one-time prep, reused below

    out = jax.block_until_ready(qnetwork_forward(x, prepared))
    ref = qnetwork_ref(x, params)
    assert out.shape == (batch, action_dim)
    assert jnp.allclose(out, ref, atol=1e-4, rtol=1e-3), "mismatch (small batch)"

    # Also exercise the batch grid + partial-last-block path (still tiny data).
    key, kx2 = jax.random.split(key)
    big_batch = 1030  # > batch_tile and not a multiple of it (or of 8)
    x2 = jax.random.normal(kx2, (big_batch, state_dim), jnp.float32)
    out2 = jax.block_until_ready(
        qnetwork_forward(x2, prepared, batch_tile=1024))
    ref2 = qnetwork_ref(x2, params)
    assert out2.shape == (big_batch, action_dim)
    assert jnp.allclose(out2, ref2, atol=1e-4, rtol=1e-3), "mismatch (tiled batch)"

    print("KERNEL_OK")
</pallas_src>

<mosaic_0001>
module attributes {stable_mosaic.version = 11 : i64} {
  func.func @kernel(%arg0: i32, %arg1: memref<8x16xbf16, #tpu.memory_space<vmem>>, %arg2: memref<16x128xbf16, #tpu.memory_space<vmem>>, %arg3: memref<1x128xf32, #tpu.memory_space<vmem>>, %arg4: memref<128x128xbf16, #tpu.memory_space<vmem>>, %arg5: memref<1x128xf32, #tpu.memory_space<vmem>>, %arg6: memref<128x8xbf16, #tpu.memory_space<vmem>>, %arg7: memref<1x8xf32, #tpu.memory_space<vmem>>, %arg8: memref<8x8xf32, #tpu.memory_space<vmem>>) attributes {dimension_semantics = [#tpu.dimension_semantics<parallel>], iteration_bounds = array<i64: 1>, scalar_prefetch = 0 : i64, scratch_operands = 0 : i64, tpu.core_type = #tpu.core_type<tc>, window_params = [{transform_indices = @transform_0, window_bounds = array<i64: 8, 16>}, {pipeline_mode = #tpu.pipeline_mode<synchronous>, transform_indices = @transform_1, window_bounds = array<i64: 16, 128>}, {pipeline_mode = #tpu.pipeline_mode<synchronous>, transform_indices = @transform_2, window_bounds = array<i64: 1, 128>}, {pipeline_mode = #tpu.pipeline_mode<synchronous>, transform_indices = @transform_3, window_bounds = array<i64: 128, 128>}, {pipeline_mode = #tpu.pipeline_mode<synchronous>, transform_indices = @transform_4, window_bounds = array<i64: 1, 128>}, {pipeline_mode = #tpu.pipeline_mode<synchronous>, transform_indices = @transform_5, window_bounds = array<i64: 128, 8>}, {pipeline_mode = #tpu.pipeline_mode<synchronous>, transform_indices = @transform_6, window_bounds = array<i64: 1, 8>}, {transform_indices = @transform_7, window_bounds = array<i64: 8, 8>}]} {
    %c0 = arith.constant 0 : index
    %c0_0 = arith.constant 0 : index
    %0 = vector.load %arg1[%c0, %c0_0] : memref<8x16xbf16, #tpu.memory_space<vmem>>, vector<8x16xbf16>
    %c0_1 = arith.constant 0 : index
    %c0_2 = arith.constant 0 : index
    %1 = vector.load %arg2[%c0_1, %c0_2] : memref<16x128xbf16, #tpu.memory_space<vmem>>, vector<16x128xbf16>
    %c0_3 = arith.constant 0 : index
    %c0_4 = arith.constant 0 : index
    %2 = vector.load %arg3[%c0_3, %c0_4] : memref<1x128xf32, #tpu.memory_space<vmem>>, vector<1x128xf32>
    %cst = arith.constant dense<0.000000e+00> : vector<8x128xf32>
    %3 = tpu.matmul %0, %1, %cst {dimension_numbers = #tpu.dot_dimension_numbers<[1], [0], [0], [1], [0, 0, 1, 1], [], []>} : vector<8x16xbf16>, vector<16x128xbf16>, vector<8x128xf32> -> vector<8x128xf32>
    %4 = vector.broadcast %2 : vector<1x128xf32> to vector<8x128xf32>
    %5 = arith.addf %3, %4 : vector<8x128xf32>
    %cst_5 = arith.constant 0.000000e+00 : f32
    %6 = vector.broadcast %cst_5 : f32 to vector<8x128xf32>
    %7 = arith.maximumf %5, %6 : vector<8x128xf32>
    %8 = arith.truncf %7 : vector<8x128xf32> to vector<8x128xbf16>
    %c0_6 = arith.constant 0 : index
    %c0_7 = arith.constant 0 : index
    %9 = vector.load %arg4[%c0_6, %c0_7] : memref<128x128xbf16, #tpu.memory_space<vmem>>, vector<128x128xbf16>
    %c0_8 = arith.constant 0 : index
    %c0_9 = arith.constant 0 : index
    %10 = vector.load %arg5[%c0_8, %c0_9] : memref<1x128xf32, #tpu.memory_space<vmem>>, vector<1x128xf32>
    %cst_10 = arith.constant dense<0.000000e+00> : vector<8x128xf32>
    %11 = tpu.matmul %8, %9, %cst_10 {dimension_numbers = #tpu.dot_dimension_numbers<[1], [0], [0], [1], [0, 0, 1, 1], [], []>} : vector<8x128xbf16>, vector<128x128xbf16>, vector<8x128xf32> -> vector<8x128xf32>
    %12 = vector.broadcast %10 : vector<1x128xf32> to vector<8x128xf32>
    %13 = arith.addf %11, %12 : vector<8x128xf32>
    %cst_11 = arith.constant 0.000000e+00 : f32
    %14 = vector.broadcast %cst_11 : f32 to vector<8x128xf32>
    %15 = arith.maximumf %13, %14 : vector<8x128xf32>
    %16 = arith.truncf %15 : vector<8x128xf32> to vector<8x128xbf16>
    %c0_12 = arith.constant 0 : index
    %c0_13 = arith.constant 0 : index
    %17 = vector.load %arg6[%c0_12, %c0_13] : memref<128x8xbf16, #tpu.memory_space<vmem>>, vector<128x8xbf16>
    %c0_14 = arith.constant 0 : index
    %c0_15 = arith.constant 0 : index
    %18 = vector.load %arg7[%c0_14, %c0_15] : memref<1x8xf32, #tpu.memory_space<vmem>>, vector<1x8xf32>
    %cst_16 = arith.constant dense<0.000000e+00> : vector<8x8xf32>
    %19 = tpu.matmul %16, %17, %cst_16 {dimension_numbers = #tpu.dot_dimension_numbers<[1], [0], [0], [1], [0, 0, 1, 1], [], []>} : vector<8x128xbf16>, vector<128x8xbf16>, vector<8x8xf32> -> vector<8x8xf32>
    %20 = vector.broadcast %18 : vector<1x8xf32> to vector<8x8xf32>
    %21 = arith.addf %19, %20 : vector<8x8xf32>
    %c0_17 = arith.constant 0 : index
    %c0_18 = arith.constant 0 : index
    %22 = vector.load %arg8[%c0_17, %c0_18] : memref<8x8xf32, #tpu.memory_space<vmem>>, vector<8x8xf32>
    tpu.vector_store %arg8[%c0_17, %c0_18], %21 {strides = array<i32>} : memref<8x8xf32, #tpu.memory_space<vmem>>, vector<8x8xf32>,
    return
  }
  func.func @transform_0(%arg0: i32) -> (i32, i32) {
    %c0_i32 = arith.constant 0 : i32
    %c0_i32_0 = arith.constant 0 : i32
    return %arg0, %c0_i32 : i32, i32
  }
  func.func @transform_1(%arg0: i32) -> (i32, i32) {
    %c0_i32 = arith.constant 0 : i32
    %c0_i32_0 = arith.constant 0 : i32
    %c0_i32_1 = arith.constant 0 : i32
    return %c0_i32, %c0_i32_0 : i32, i32
  }
  func.func @transform_2(%arg0: i32) -> (i32, i32) {
    %c0_i32 = arith.constant 0 : i32
    %c0_i32_0 = arith.constant 0 : i32
    %c0_i32_1 = arith.constant 0 : i32
    return %c0_i32, %c0_i32_0 : i32, i32
  }
  func.func @transform_3(%arg0: i32) -> (i32, i32) {
    %c0_i32 = arith.constant 0 : i32
    %c0_i32_0 = arith.constant 0 : i32
    %c0_i32_1 = arith.constant 0 : i32
    return %c0_i32, %c0_i32_0 : i32, i32
  }
  func.func @transform_4(%arg0: i32) -> (i32, i32) {
    %c0_i32 = arith.constant 0 : i32
    %c0_i32_0 = arith.constant 0 : i32
    %c0_i32_1 = arith.constant 0 : i32
    return %c0_i32, %c0_i32_0 : i32, i32
  }
  func.func @transform_5(%arg0: i32) -> (i32, i32) {
    %c0_i32 = arith.constant 0 : i32
    %c0_i32_0 = arith.constant 0 : i32
    %c0_i32_1 = arith.constant 0 : i32
    return %c0_i32, %c0_i32_0 : i32, i32
  }
  func.func @transform_6(%arg0: i32) -> (i32, i32) {
    %c0_i32 = arith.constant 0 : i32
    %c0_i32_0 = arith.constant 0 : i32
    %c0_i32_1 = arith.constant 0 : i32
    return %c0_i32, %c0_i32_0 : i32, i32
  }
  func.func @transform_7(%arg0: i32) -> (i32, i32) {
    %c0_i32 = arith.constant 0 : i32
    %c0_i32_0 = arith.constant 0 : i32
    return %arg0, %c0_i32 : i32, i32
  }
}

</mosaic_0001>

<bundles_post_ra>
// kernel: tpu_custom_call.1
= control target key start
LH: loop header
LB: loop body
LE: loop exit
PB: predicated region body
PF: predicated region fallthrough
CT: control target
= control target key end

     0   :  { %12 = vsyncpa [#allocation3], 0  ;;  %s596_s0 = inlined_call_operand.vmem [shape: bf16[8,16], index: 0, kind: input, shape index: {}]   ;;  %s597_s1 = inlined_call_operand.hbm [shape: bf16[16,128], index: 1, kind: input, shape index: {}]   ;;  %s598_s2 = inlined_call_operand.hbm [shape: f32[1,128], index: 2, kind: input, shape index: {}]   ;;  %s599_s3 = inlined_call_operand.vmem [shape: bf16[128,128], index: 3, kind: input, shape index: {}]   ;;  %s600_s4 = inlined_call_operand.hbm [shape: f32[1,128], index: 4, kind: input, shape index: {}]   ;;  %s601_s5 = inlined_call_operand.vmem [shape: bf16[128,8], index: 5, kind: input, shape index: {}]   ;;  %s602_s6 = inlined_call_operand.vmem [shape: f32[1,8], index: 6, kind: input, shape index: {}]   ;;  %s603_s7 = inlined_call_operand.hbm [shape: f32[8,8], index: 7, kind: output, shape index: {}]  }
   0x1   :  { %13 = vsyncpa [#allocation6], 0  ;;  %s35_s26 = sshll.u32 %s598_s2, 4  ;;  %s36_s26 = int_to_ptr.hbm [resolvable:$true] %s35_s26 }
   0x2   :  { %14 = vsyncpa [#allocation4], 0  ;;  %s484_s27 = smov [#allocation5]   ;;  %s21_s8 = sshll.u32 %s597_s1, 4  ;;  %s22_s8 = int_to_ptr.hbm [resolvable:$true] %s21_s8 }
   0x3   :  { %s37_s28 = sshll.u32 %s484_s27, 4  ;;  %s485_s9 = smov [#allocation2]   ;;  %s38_s28 = int_to_ptr.vmem [resolvable:$true] %s37_s28 }
   0x4   :  { %40 = dma.hbm_to_vmem [thread:$0]  %s36_s26, 16, %s38_s28, [#allocation6]  }
   0x5   :  { %s23_s10 = sshll.u32 %s485_s9, 4  ;;  %s486_s11 = smov 64   ;;  %s24_s10 = int_to_ptr.vmem [resolvable:$true] %s23_s10 }
   0x6   :  { %s487_s12 = smov 4   ;;  %s48_s2 = sshll.u32 %s600_s4, 4  ;;  %s49_s2 = int_to_ptr.hbm [resolvable:$true] %s48_s2 }
   0x7   :  { %29 = dma.hbm_to_vmem [thread:$0]  %s22_s8, 128, %s24_s10, [#allocation3], %s486_s11, %s486_s11, %s487_s12  }
   0x8   :  { %s488_s15 = smov [#allocation7]  }
   0x9   :  { %s50_s16 = sshll.u32 %s488_s15, 4  ;;  %s51_s16 = int_to_ptr.vmem [resolvable:$true] %s50_s16 }
   0xa   :  { %53 = dma.hbm_to_vmem [thread:$0]  %s49_s2, 16, %s51_s16, [#allocation6]  }
   0xb   :  { %478 = dma.done.wait [#allocation3], 128  }
   0xc   :  { %479 = vsyncadd [#allocation3], 4294967168 }
   0xd   :  { %480 = dma.done.wait [#allocation6], 32  }
   0xe   :  { %481 = vsyncadd [#allocation6], 4294967264  ;;  %v356_v0 = vld [vmem:[#allocation2] sm:$0xff]  ;;  %v364_v1 = vld [vmem:[%s599_s3 + $0x38] sm:$0xff]  ;;  %vm84_vm0 = vcmask 130048   ;;  %s489_s23 = smov [#allocation8]  }
   0xf   :  { %95 = vmatpush.bf16.msra.mxu0 %v356_v0  ;;  %v71_v2 = vld [vmem:[%s596_s0] sm:$0xf]  ;;  %171 = vmatpush.bf16.msra.mxu1 %v364_v1  ;;  %v363_v3 = vld [vmem:[%s599_s3 + $0x30] sm:$0xff]  ;;  %v362_v4 = vld [vmem:[%s599_s3 + $0x28] sm:$0xff]  ;;  %s274_s24 = sshll.u32 %s489_s23, 4  ;;  %s276_s26 = sshll.u32 %s603_s7, 4  ;;  %s275_s24 = int_to_ptr.vmem [resolvable:$true] %s274_s24  ;;  %s277_s26 = int_to_ptr.hbm [resolvable:$true] %s276_s26 }
  0x10   :  { %v361_v5 = vld [vmem:[%s599_s3 + $0x20] sm:$0xff]  ;;  %v360_v6 = vld [vmem:[%s599_s3 + $0x18] sm:$0xff]  ;;  %v359_v7 = vld [vmem:[%s599_s3 + $0x10] sm:$0xff]  ;;  %vm267_vm1 = vcmask 64512  }
  0x11   :  { %v358_v8 = vld [vmem:[%s599_s3 + $0x8] sm:$0xff]  ;;  %v357_v9 = vld [vmem:[%s599_s3] sm:$0xff]  ;;  %v372_v10 = vld [vmem:[%s601_s5 + $0x38] sm:$0xff] }
  0x12   :  { %291 = vmatmul.msk.bf16.vlgmr.msra.gmra.mxu0 %vm84_vm0, %v71_v2  ;;  %254 = vmatpush.bf16.msra.mxu2 %v372_v10  ;;  %v371_v11 = vld [vmem:[%s601_s5 + $0x30] sm:$0xff]  ;;  %v370_v12 = vld [vmem:[%s601_s5 + $0x28] sm:$0xff]  ;;  %v369_v13 = vld [vmem:[%s601_s5 + $0x20] sm:$0xff] }
  0x13   :  { %172 = vmatpush.bf16.msra.mxu1 %v363_v3  ;;  %v368_v14 = vld [vmem:[%s601_s5 + $0x18] sm:$0xff]  ;;  %v367_v15 = vld [vmem:[%s601_s5 + $0x10] sm:$0xff]  ;;  %v379_v16 = vld [vmem:[#allocation5] ss:$0 sm:$0xff] }
  0x14   :  { %v366_v22 = vld [vmem:[%s601_s5 + $0x8] sm:$0xff]  ;;  %v365_v23 = vld [vmem:[%s601_s5] sm:$0xff] }
  0x15   :  { %v380_v24 = vld [vmem:[#allocation7] ss:$0 sm:$0xff]  ;;  %v381_v30 = vld [vmem:[%s602_s6] ss:$0 sm:$0xff] }
  0x16   :  { %255 = vmatpush.bf16.msra.mxu2 %v371_v11 }
  0x17   :  { %173 = vmatpush.bf16.msra.mxu1 %v362_v4 }
  0x1a   :  { %256 = vmatpush.bf16.msra.mxu2 %v370_v12 }
  0x1b   :  { %174 = vmatpush.bf16.msra.mxu1 %v361_v5 }
  0x1e   :  { %257 = vmatpush.bf16.msra.mxu2 %v369_v13 }
  0x1f   :  { %175 = vmatpush.bf16.msra.mxu1 %v360_v6 }
  0x22   :  { %258 = vmatpush.bf16.msra.mxu2 %v368_v14 }
  0x23   :  { %176 = vmatpush.bf16.msra.mxu1 %v359_v7 }
  0x26   :  { %259 = vmatpush.bf16.msra.mxu2 %v367_v15 }
  0x27   :  { %177 = vmatpush.bf16.msra.mxu1 %v358_v8 }
  0x2a   :  { %260 = vmatpush.bf16.msra.mxu2 %v366_v22 }
  0x2b   :  { %178 = vmatpush.bf16.msra.mxu1 %v357_v9 }
  0x2e   :  { %261 = vmatpush.bf16.msra.mxu2 %v365_v23 }
  0x8f   :  { %v97_v17 = vpop.f32.mrf.mxu0 }
  0x90   :  { %v98_v18 = vadd.f32 %v379_v16, %v97_v17 }
  0x92   :  { %v101_v19 = vmax.f32 %v98_v18, 0.0 }
  0x94   :  { %v102_v20 = vpack.c.bf16 %v101_v19, %v101_v19 }
  0x96   :  { %179 = vmatmul.bf16.vlgmr.msra.gmra.mxu1 %v102_v20 }
  0x97   :  { %v99_v21 = vpop.f32.mrf.mxu0 }
 0x113   :  { %v180_v25 = vpop.f32.mrf.mxu1 }
 0x114   :  { %v181_v26 = vadd.f32 %v380_v24, %v180_v25 }
 0x116   :  { %v184_v27 = vmax.f32 %v181_v26, 0.0 }
 0x118   :  { %v185_v28 = vpack.c.bf16 %v184_v27, %v184_v27 }
 0x11a   :  { %262 = vmatmul.bf16.vlgmr.msra.gmra.mxu2 %v185_v28 }
 0x11b   :  { %v182_v29 = vpop.f32.mrf.mxu1 }
 0x19d   :  { %v263_v31 = vpop.f32.mrf.mxu2 }
 0x19e   :  { %v264_v32 = vadd.f32 %v381_v30, %v263_v31 }
 0x1a0   :  { %268 = vst.msk [vmem:[#allocation8] sm:$0xff] %vm267_vm1, %v264_v32 }
 0x1a1   :  { %279 = dma.vmem_to_hbm [thread:$0]  %s275_s24, 128, %s277_s26, [#allocation4]  }
 0x1a5   :  { %v265_v33 = vpop.f32.mrf.mxu2 }
 0x1a6   :  { %482 = dma.done.wait [#allocation4], 128  }
 0x1a7   :  { %483 = vsyncadd [#allocation4], 4294967168 }
 0x1a8   :  { %284 = vsyncpa [#allocation3], 1 }
 0x1a9   :  { %285 = vsyncpa [#allocation6], 1 }
 0x1aa   :  { %286 = vsyncpa [#allocation4], 1 }

</bundles_post_ra>
